<compile_context>
chip_gen: v7x
topology: tpu7x:2x2x1
jax: 0.10.0
libtpu: 0.0.40
codegen_flags: <defaults>
</compile_context>

<pallas_src>
import jax
import jax.numpy as jnp
from jax import lax
from jax.experimental import pallas as pl
from jax.experimental.pallas import tpu as pltpu


_MIB = 1024 * 1024
_ONEHOT_BUDGET_BYTES = 2 * _MIB       # per (num_nodes, TILE_E) f32 one-hot selector
_MAX_EDGES_PER_CALL = 1 << 15         # keeps scalar-prefetched indices inside SMEM


def _round_up(x, m):
    return ((x + m - 1) // m) * m


def _vmem_capacity_bytes():
    """Physical VMEM per TensorCore (128 MiB on v5e/v6e, 64 MiB on v7x)."""
    try:
        cap = getattr(pltpu.get_tpu_info(), "vmem_capacity_bytes", None)
        if cap:
            return int(cap)
    except Exception:
        pass
    return 64 * _MIB                  # conservative default (v7x per-TC figure)


# ---------------------------------------------------------------------------
# Path A: VMEM-resident node table(s), one-hot MXU gather, lane-dense output.
# ---------------------------------------------------------------------------
def _make_resident_kernel(shared):
    def kernel(*refs):
        if shared:
            hidx_ref, tidx_ref, rel1_ref, rel2_ref, tab_ref, out_ref = refs
            head_tab_ref, tail_tab_ref = tab_ref, tab_ref
        else:
            (hidx_ref, tidx_ref, rel1_ref, rel2_ref,
             head_tab_ref, tail_tab_ref, out_ref) = refs

        two_d = rel1_ref.shape[1]
        d = two_d // 2
        tile_e = out_ref.shape[1]

        def gather_t(tab_ref_, idx_ref):
            # One-hot row gather on the otherwise idle MXU:
            #   (2D, N) @ (N, TILE_E) -> (2D, TILE_E)   (feature-major / lane-dense)
            n = tab_ref_.shape[1]
            sel = (lax.broadcasted_iota(jnp.int32, (n, tile_e), 0)
                   == idx_ref[...]).astype(jnp.float32)
            return jnp.dot(tab_ref_[...], sel, preferred_element_type=jnp.float32)

        h = gather_t(head_tab_ref, hidx_ref)            # (2D, TILE_E)
        t = gather_t(tail_tab_ref, tidx_ref)            # (2D, TILE_E)
        # swap halves: [t_re, t_im] -> [t_im, t_re]
        t_sw = jnp.concatenate([t[d:, :], t[:d, :]], axis=0)
        # ComplEx score with the relation folded into two precomputed rows
        #   rel1 = [r_re, r_re],  rel2 = [r_im, -r_im]
        # reduced on the MXU as two (1, 2D) @ (2D, TILE_E) matvecs -> (1, TILE_E).
        score = (jnp.dot(rel1_ref[...], h * t, preferred_element_type=jnp.float32)
                 + jnp.dot(rel2_ref[...], h * t_sw, preferred_element_type=jnp.float32))
        out_ref[...] = score.astype(out_ref.dtype)      # lane-dense (1, TILE_E)

    return kernel


def _scores_resident(head_table, tail_table, rel1, rel2, head_idx, tail_idx,
                     *, tile_e, vmem_limit):
    shared = head_table is tail_table
    two_d = head_table.shape[1]
    e = int(head_idx.shape[0])
    e_pad = _round_up(e, tile_e)
    num_tiles = e_pad // tile_e
    pad = e_pad - e

    # Lane-dense (1, E_pad) index / output layouts (pad edges gather node 0).
    hidx = jnp.pad(head_idx.astype(jnp.int32), (0, pad)).reshape(1, e_pad)
    tidx = jnp.pad(tail_idx.astype(jnp.int32), (0, pad)).reshape(1, e_pad)

    # Tables stay VMEM-resident (constant block index -> fetched once),
    # transposed so the gathered tile is feature-major / lane-dense.
    tabs = [jnp.transpose(head_table).astype(jnp.float32)]
    if not shared:
        tabs.append(jnp.transpose(tail_table).astype(jnp.float32))

    idx_spec = pl.BlockSpec((1, tile_e), lambda i: (0, i))
    rel_spec = pl.BlockSpec((1, two_d), lambda i: (0, 0))
    tab_specs = [pl.BlockSpec(t.shape, lambda i: (0, 0)) for t in tabs]

    out = pl.pallas_call(
        _make_resident_kernel(shared),
        out_shape=jax.ShapeDtypeStruct((1, e_pad), jnp.float32),
        grid=(num_tiles,),
        in_specs=[idx_spec, idx_spec, rel_spec, rel_spec] + tab_specs,
        out_specs=pl.BlockSpec((1, tile_e), lambda i: (0, i)),
        compiler_params=pltpu.CompilerParams(
            # E-tiles are independent -> megacore-friendly on v7x.
            dimension_semantics=("parallel",),
            vmem_limit_bytes=vmem_limit,
        ),
    )(hidx, tidx, rel1, rel2, *tabs)

    return out[0, :e]


# ---------------------------------------------------------------------------
# Path B: fused per-row HBM DMA gather, cross-tile double-buffered.
# ---------------------------------------------------------------------------
def _dma_gather_kernel(hidx_ref, tidx_ref,            # SMEM scalar prefetch (E_pad,)
                       rel1_ref, rel2_ref,            # (1, 2D) VMEM, resident
                       head_tab_ref, tail_tab_ref,    # node tables left in HBM (pl.ANY)
                       out_ref,                       # (TILE_E, 1)
                       head_buf, tail_buf,            # (2, TILE_E, 2D) VMEM double buffer
                       sem):                          # DMA sems (2 endpoints, 2 slots)
    i = pl.program_id(0)
    n_tiles = pl.num_programs(0)
    _, tile_e, two_d = head_buf.shape
    d = two_d // 2

    def issue(tile_idx, slot):
        base = pl.multiple_of(tile_idx * tile_e, tile_e)

        def body(r, carry):
            h = hidx_ref[base + r]
            t = tidx_ref[base + r]
            pltpu.make_async_copy(head_tab_ref.at[h], head_buf.at[slot, r],
                                  sem.at[0, slot]).start()
            pltpu.make_async_copy(tail_tab_ref.at[t], tail_buf.at[slot, r],
                                  sem.at[1, slot]).start()
            return carry

        # Unrolled so SMEM index loads (scalar slots) and DMA descriptor builds
        # (misc slot) can co-issue.
        lax.fori_loop(0, tile_e, body, None, unroll=8)

    @pl.when(i == 0)
    def _prologue():
        issue(i, 0)                                    # prime slot 0 with tile 0

    # Cross-tile double buffering: issue tile i+1's gather into the other slot
    # *before* waiting on tile i (index reads stay ahead of any .wait(), which
    # also keeps SMEM sst->sld forwarding intact).
    @pl.when(i + 1 < n_tiles)
    def _prefetch_next():
        issue(i + 1, (i + 1) % 2)

    slot = i % 2
    # Aggregate wait: DMA semaphores count bytes and every row copy into this
    # slot is exactly one (2D,) f32 row, so a single buffer-sized wait drains
    # all TILE_E completions.  NOTE: keep every row copy the same shape/dtype,
    # otherwise the byte accounting desynchronizes.
    pltpu.make_async_copy(head_buf.at[slot], head_buf.at[slot], sem.at[0, slot]).wait()
    pltpu.make_async_copy(tail_buf.at[slot], tail_buf.at[slot], sem.at[1, slot]).wait()

    head = head_buf[slot]                              # (TILE_E, 2D)
    tail = tail_buf[slot]
    tail_sw = jnp.concatenate([tail[:, d:], tail[:, :d]], axis=1)  # [t_im, t_re]
    score = (head * tail * rel1_ref[...]
             + head * tail_sw * rel2_ref[...]).sum(axis=-1, keepdims=True)
    out_ref[...] = score.astype(out_ref.dtype)


def _scores_dma_gather(head_table, tail_table, rel1, rel2, head_idx, tail_idx,
                       *, tile_e, vmem_limit):
    two_d = head_table.shape[1]
    e = int(head_idx.shape[0])
    e_pad = _round_up(e, tile_e)
    num_tiles = e_pad // tile_e
    pad = e_pad - e
    hidx = jnp.pad(head_idx.astype(jnp.int32), (0, pad))   # pad rows gather node 0
    tidx = jnp.pad(tail_idx.astype(jnp.int32), (0, pad))

    grid_spec = pltpu.PrefetchScalarGridSpec(
        num_scalar_prefetch=2,
        grid=(num_tiles,),
        in_specs=[
            pl.BlockSpec((1, two_d), lambda i, hi, ti: (0, 0)),   # rel1, resident
            pl.BlockSpec((1, two_d), lambda i, hi, ti: (0, 0)),   # rel2, resident
            pl.BlockSpec(memory_space=pl.ANY),                    # head table (HBM)
            pl.BlockSpec(memory_space=pl.ANY),                    # tail table (HBM)
        ],
        out_specs=pl.BlockSpec((tile_e, 1), lambda i, hi, ti: (i, 0)),
        scratch_shapes=[
            pltpu.VMEM((2, tile_e, two_d), jnp.float32),
            pltpu.VMEM((2, tile_e, two_d), jnp.float32),
            pltpu.SemaphoreType.DMA((2, 2)),
        ],
    )

    out = pl.pallas_call(
        _dma_gather_kernel,
        out_shape=jax.ShapeDtypeStruct((e_pad, 1), jnp.float32),
        grid_spec=grid_spec,
        compiler_params=pltpu.CompilerParams(
            # The cross-tile prefetch is stateful across grid steps, so the E
            # axis must stay sequential; on v7x split work across TensorCores
            # at a higher level (per edge type / edge chunk).
            dimension_semantics=("arbitrary",),
            vmem_limit_bytes=vmem_limit,
        ),
    )(hidx, tidx, rel1, rel2,
      head_table.astype(jnp.float32), tail_table.astype(jnp.float32))

    return out[:e, 0]


# ---------------------------------------------------------------------------
# Dispatcher
# ---------------------------------------------------------------------------
def complex_scores_pallas(head_table, tail_table, rel_row, head_idx, tail_idx,
                          *, tile_e=None, force_dma_gather=False):
    """ComplEx scores for (head_idx[i], rel, tail_idx[i]) edges.

    head_table/tail_table: (num_nodes, 2D) f32 node embeddings.
    rel_row: (2D,) relation embedding.  Returns (E,) f32 scores.
    `tile_e` only overrides the DMA-gather path's tile size.
    """
    num_nodes_h, two_d = head_table.shape
    num_nodes_t = tail_table.shape[0]
    d = two_d // 2
    e = int(head_idx.shape[0])
    if e == 0:
        return jnp.zeros((0,), jnp.float32)

    # Relation folded into two rows (shared by both paths):
    #   rel1 = [r_re, r_re],  rel2 = [r_im, -r_im]
    rel_row = rel_row.astype(jnp.float32)
    r_re, r_im = rel_row[:d], rel_row[d:]
    rel1 = jnp.concatenate([r_re, r_re]).reshape(1, two_d)
    rel2 = jnp.concatenate([r_im, -r_im]).reshape(1, two_d)

    cap = _vmem_capacity_bytes()
    vmem_limit = int(cap * 0.75)                 # ~96 MiB v5e/v6e, ~48 MiB v7x
    resident_budget = vmem_limit - 12 * _MIB     # headroom for blocks / temporaries

    shared = head_table is tail_table
    max_nodes = max(num_nodes_h, num_nodes_t)
    table_bytes = 4 * (head_table.size if shared
                       else head_table.size + tail_table.size)

    # --- resident-path tile size (lane-aligned so the (1, TILE_E) output
    # blocks satisfy the (8, 128) tiling rule) ---
    e_pad8 = _round_up(e, 8)
    if e_pad8 <= 1024:
        res_tile = e_pad8                        # single tile covers all edges
        if e_pad8 >= 256 and (e_pad8 // 2) % 128 == 0:
            res_tile = e_pad8 // 2               # v7x: give both TensorCores a tile
    else:
        res_tile = 512
        while res_tile > 128 and res_tile * max_nodes * 4 > _ONEHOT_BUDGET_BYTES:
            res_tile //= 2

    onehot_bytes = 2 * res_tile * max_nodes * 4
    work_bytes = onehot_bytes + 4 * res_tile * two_d * 4
    use_resident = (not force_dma_gather
                    and res_tile * max_nodes * 4 <= _ONEHOT_BUDGET_BYTES
                    # 2x: Pallas may double-buffer even constant-index blocks.
                    and 2 * table_bytes + work_bytes <= resident_budget)

    if use_resident:
        return _scores_resident(head_table, tail_table, rel1, rel2,
                                head_idx, tail_idx,
                                tile_e=res_tile, vmem_limit=vmem_limit)

    # --- DMA-gather path tile size: big tiles amortize grid overhead, capped
    # so the double-buffered scratch stays <= ~16 MiB (safe on v7x's 64 MiB). ---
    dma_tile = tile_e if tile_e is not None else 512
    dma_tile = max(8, min(_round_up(dma_tile, 8), _round_up(e, 8)))
    while dma_tile > 8 and 2 * 2 * dma_tile * two_d * 4 > 16 * _MIB:
        dma_tile = max(8, _round_up(dma_tile // 2, 8))

    if e > _MAX_EDGES_PER_CALL:
        # Chunk so the scalar-prefetched (E,) index arrays stay inside SMEM.
        parts = []
        for s in range(0, e, _MAX_EDGES_PER_CALL):
            parts.append(_scores_dma_gather(
                head_table, tail_table, rel1, rel2,
                head_idx[s:s + _MAX_EDGES_PER_CALL],
                tail_idx[s:s + _MAX_EDGES_PER_CALL],
                tile_e=dma_tile, vmem_limit=vmem_limit))
        return jnp.concatenate(parts, axis=0)

    return _scores_dma_gather(head_table, tail_table, rel1, rel2,
                              head_idx, tail_idx,
                              tile_e=dma_tile, vmem_limit=vmem_limit)


class ComplExJax:
    """JAX/Pallas port of the PyTorch ComplEx module's forward pass."""

    def __init__(self, embedding_dim, num_nodes, metadata, key):
        self.embedding_dim = embedding_dim
        self.metadata = metadata
        k1, k2 = jax.random.split(key)
        self.node_emb = jax.random.normal(
            k1, (num_nodes, 2 * embedding_dim), dtype=jnp.float32)
        self.rel_emb = jax.random.normal(
            k2, (len(metadata[1]), 2 * embedding_dim), dtype=jnp.float32)
        self.rel_to_index = {mp: i for i, mp in enumerate(metadata[1])}

    def forward(self, data):
        out_dict = {"node": self.node_emb}
        h_dict = {}
        for edge_t in self.metadata[1]:
            edge_label_index = data[edge_t]                    # (2, E) int32
            rel = self.rel_emb[self.rel_to_index[edge_t]]      # (2D,)
            h_dict[edge_t] = complex_scores_pallas(
                out_dict[edge_t[0]],        # head node table
                out_dict[edge_t[2]],        # tail node table
                rel,
                edge_label_index[0],
                edge_label_index[1],
            )
        return h_dict


def _reference_scores(head, tail, rel, d):
    h_re, h_im = head[:, :d], head[:, d:]
    t_re, t_im = tail[:, :d], tail[:, d:]
    r_re, r_im = rel[:d], rel[d:]
    return ((h_re * r_re * t_re).sum(-1) + (h_im * r_re * t_im).sum(-1)
            + (h_re * r_im * t_im).sum(-1) - (h_im * r_im * t_re).sum(-1))


if __name__ == "__main__":
    key = jax.random.PRNGKey(0)
    (k_model, k_e1, k_e2, k_bh, k_bt, k_tab_h, k_tab_t, k_big) = jax.random.split(key, 8)

    embedding_dim = 32
    num_nodes = 16
    num_edges = 8
    metadata = (
        ["node"],
        [("node", "cites", "node"), ("node", "follows", "node")],
    )

    model = ComplExJax(embedding_dim, num_nodes, metadata, k_model)
    data = {
        metadata[1][0]: jax.random.randint(
            k_e1, (2, num_edges), 0, num_nodes, dtype=jnp.int32),
        metadata[1][1]: jax.random.randint(
            k_e2, (2, num_edges), 0, num_nodes, dtype=jnp.int32),
    }

    h_dict = model.forward(data)
    for v in h_dict.values():
        jax.block_until_ready(v)

    def close(a, b):
        return bool(jnp.allclose(a, b, rtol=1e-4, atol=1e-4))

    ok = True

    # 1) Module forward (shared node table -> resident one-hot/MXU path).
    for edge_t in metadata[1]:
        eli = data[edge_t]
        ref = _reference_scores(model.node_emb[eli[0]], model.node_emb[eli[1]],
                                model.rel_emb[model.rel_to_index[edge_t]],
                                embedding_dim)
        got = h_dict[edge_t]
        ok = ok and got.shape == (num_edges,) and close(got, ref)

    # 2) Forced DMA-gather path, multi-tile (exercises cross-tile double
    #    buffering, aggregate waits and edge padding).
    e_b = 40
    hb = jax.random.randint(k_bh, (e_b,), 0, num_nodes, dtype=jnp.int32)
    tb = jax.random.randint(k_bt, (e_b,), 0, num_nodes, dtype=jnp.int32)
    rel_b = model.rel_emb[0]
    got_b = complex_scores_pallas(model.node_emb, model.node_emb, rel_b, hb, tb,
                                  tile_e=16, force_dma_gather=True)
    jax.block_until_ready(got_b)
    ref_b = _reference_scores(model.node_emb[hb], model.node_emb[tb],
                              rel_b, embedding_dim)
    ok = ok and got_b.shape == (e_b,) and close(got_b, ref_b)

    # 3) Resident path, distinct head/tail tables, multi-tile grid.
    nh, nt, e_c = 40, 24, 1200
    head_tab = jax.random.normal(k_tab_h, (nh, 2 * embedding_dim), dtype=jnp.float32)
    tail_tab = jax.random.normal(k_tab_t, (nt, 2 * embedding_dim), dtype=jnp.float32)
    kc1, kc2 = jax.random.split(k_big)
    hc = jax.random.randint(kc1, (e_c,), 0, nh, dtype=jnp.int32)
    tc = jax.random.randint(kc2, (e_c,), 0, nt, dtype=jnp.int32)
    got_c = complex_scores_pallas(head_tab, tail_tab, rel_b, hc, tc)
    jax.block_until_ready(got_c)
    ref_c = _reference_scores(head_tab[hc], tail_tab[tc], rel_b, embedding_dim)
    ok = ok and got_c.shape == (e_c,) and close(got_c, ref_c)

    if ok:
        print("KERNEL_OK")
    else:
        print("KERNEL_MISMATCH")
</pallas_src>

<mosaic_0001>
module attributes {stable_mosaic.version = 11 : i64} {
  func.func @kernel(%arg0: i32, %arg1: memref<1x8xi32, #tpu.memory_space<vmem>>, %arg2: memref<1x8xi32, #tpu.memory_space<vmem>>, %arg3: memref<1x64xf32, #tpu.memory_space<vmem>>, %arg4: memref<1x64xf32, #tpu.memory_space<vmem>>, %arg5: memref<64x16xf32, #tpu.memory_space<vmem>>, %arg6: memref<1x8xf32, #tpu.memory_space<vmem>>) attributes {dimension_semantics = [#tpu.dimension_semantics<parallel>], iteration_bounds = array<i64: 1>, scalar_prefetch = 0 : i64, scratch_operands = 0 : i64, tpu.core_type = #tpu.core_type<tc>, window_params = [{transform_indices = @transform_0, window_bounds = array<i64: 1, 8>}, {transform_indices = @transform_1, window_bounds = array<i64: 1, 8>}, {pipeline_mode = #tpu.pipeline_mode<synchronous>, transform_indices = @transform_2, window_bounds = array<i64: 1, 64>}, {pipeline_mode = #tpu.pipeline_mode<synchronous>, transform_indices = @transform_3, window_bounds = array<i64: 1, 64>}, {pipeline_mode = #tpu.pipeline_mode<synchronous>, transform_indices = @transform_4, window_bounds = array<i64: 64, 16>}, {transform_indices = @transform_5, window_bounds = array<i64: 1, 8>}]} {
    %0 = tpu.iota {dimensions = array<i32: 0>} : vector<16x8xi32>
    %c0 = arith.constant 0 : index
    %c0_0 = arith.constant 0 : index
    %1 = vector.load %arg1[%c0, %c0_0] : memref<1x8xi32, #tpu.memory_space<vmem>>, vector<1x8xi32>
    %2 = vector.broadcast %1 : vector<1x8xi32> to vector<16x8xi32>
    %3 = arith.cmpi eq, %0, %2 : vector<16x8xi32>
    %4 = arith.extui %3 : vector<16x8xi1> to vector<16x8xi32>
    %5 = arith.sitofp %4 : vector<16x8xi32> to vector<16x8xf32>
    %c0_1 = arith.constant 0 : index
    %c0_2 = arith.constant 0 : index
    %6 = vector.load %arg5[%c0_1, %c0_2] : memref<64x16xf32, #tpu.memory_space<vmem>>, vector<64x16xf32>
    %cst = arith.constant dense<0.000000e+00> : vector<64x8xf32>
    %7 = tpu.matmul %6, %5, %cst {dimension_numbers = #tpu.dot_dimension_numbers<[1], [0], [0], [1], [0, 0, 1, 1], [], []>} : vector<64x16xf32>, vector<16x8xf32>, vector<64x8xf32> -> vector<64x8xf32>
    %8 = tpu.iota {dimensions = array<i32: 0>} : vector<16x8xi32>
    %c0_3 = arith.constant 0 : index
    %c0_4 = arith.constant 0 : index
    %9 = vector.load %arg2[%c0_3, %c0_4] : memref<1x8xi32, #tpu.memory_space<vmem>>, vector<1x8xi32>
    %10 = vector.broadcast %9 : vector<1x8xi32> to vector<16x8xi32>
    %11 = arith.cmpi eq, %8, %10 : vector<16x8xi32>
    %12 = arith.extui %11 : vector<16x8xi1> to vector<16x8xi32>
    %13 = arith.sitofp %12 : vector<16x8xi32> to vector<16x8xf32>
    %c0_5 = arith.constant 0 : index
    %c0_6 = arith.constant 0 : index
    %14 = vector.load %arg5[%c0_5, %c0_6] : memref<64x16xf32, #tpu.memory_space<vmem>>, vector<64x16xf32>
    %cst_7 = arith.constant dense<0.000000e+00> : vector<64x8xf32>
    %15 = tpu.matmul %14, %13, %cst_7 {dimension_numbers = #tpu.dot_dimension_numbers<[1], [0], [0], [1], [0, 0, 1, 1], [], []>} : vector<64x16xf32>, vector<16x8xf32>, vector<64x8xf32> -> vector<64x8xf32>
    %16 = vector.extract_strided_slice %15 {offsets = [32, 0], sizes = [32, 8], strides = [1, 1]} : vector<64x8xf32> to vector<32x8xf32>
    %17 = vector.extract_strided_slice %15 {offsets = [0, 0], sizes = [32, 8], strides = [1, 1]} : vector<64x8xf32> to vector<32x8xf32>
    %18 = tpu.concatenate %16, %17 in 0 : vector<32x8xf32>, vector<32x8xf32> -> vector<64x8xf32>
    %c0_8 = arith.constant 0 : index
    %c0_9 = arith.constant 0 : index
    %19 = vector.load %arg3[%c0_8, %c0_9] : memref<1x64xf32, #tpu.memory_space<vmem>>, vector<1x64xf32>
    %20 = arith.mulf %7, %15 : vector<64x8xf32>
    %cst_10 = arith.constant dense<0.000000e+00> : vector<1x8xf32>
    %21 = tpu.matmul %19, %20, %cst_10 {dimension_numbers = #tpu.dot_dimension_numbers<[1], [0], [0], [1], [0, 0, 1, 1], [], []>} : vector<1x64xf32>, vector<64x8xf32>, vector<1x8xf32> -> vector<1x8xf32>
    %c0_11 = arith.constant 0 : index
    %c0_12 = arith.constant 0 : index
    %22 = vector.load %arg4[%c0_11, %c0_12] : memref<1x64xf32, #tpu.memory_space<vmem>>, vector<1x64xf32>
    %23 = arith.mulf %7, %18 : vector<64x8xf32>
    %cst_13 = arith.constant dense<0.000000e+00> : vector<1x8xf32>
    %24 = tpu.matmul %22, %23, %cst_13 {dimension_numbers = #tpu.dot_dimension_numbers<[1], [0], [0], [1], [0, 0, 1, 1], [], []>} : vector<1x64xf32>, vector<64x8xf32>, vector<1x8xf32> -> vector<1x8xf32>
    %25 = arith.addf %21, %24 : vector<1x8xf32>
    %c0_14 = arith.constant 0 : index
    %c0_15 = arith.constant 0 : index
    %26 = vector.load %arg6[%c0_14, %c0_15] : memref<1x8xf32, #tpu.memory_space<vmem>>, vector<1x8xf32>
    tpu.vector_store %arg6[%c0_14, %c0_15], %25 {strides = array<i32>} : memref<1x8xf32, #tpu.memory_space<vmem>>, vector<1x8xf32>,
    return
  }
  func.func @transform_0(%arg0: i32) -> (i32, i32) {
    %c0_i32 = arith.constant 0 : i32
    %c0_i32_0 = arith.constant 0 : i32
    return %c0_i32, %arg0 : i32, i32
  }
  func.func @transform_1(%arg0: i32) -> (i32, i32) {
    %c0_i32 = arith.constant 0 : i32
    %c0_i32_0 = arith.constant 0 : i32
    return %c0_i32, %arg0 : i32, i32
  }
  func.func @transform_2(%arg0: i32) -> (i32, i32) {
    %c0_i32 = arith.constant 0 : i32
    %c0_i32_0 = arith.constant 0 : i32
    %c0_i32_1 = arith.constant 0 : i32
    return %c0_i32, %c0_i32_0 : i32, i32
  }
  func.func @transform_3(%arg0: i32) -> (i32, i32) {
    %c0_i32 = arith.constant 0 : i32
    %c0_i32_0 = arith.constant 0 : i32
    %c0_i32_1 = arith.constant 0 : i32
    return %c0_i32, %c0_i32_0 : i32, i32
  }
  func.func @transform_4(%arg0: i32) -> (i32, i32) {
    %c0_i32 = arith.constant 0 : i32
    %c0_i32_0 = arith.constant 0 : i32
    %c0_i32_1 = arith.constant 0 : i32
    return %c0_i32, %c0_i32_0 : i32, i32
  }
  func.func @transform_5(%arg0: i32) -> (i32, i32) {
    %c0_i32 = arith.constant 0 : i32
    %c0_i32_0 = arith.constant 0 : i32
    return %c0_i32, %arg0 : i32, i32
  }
}

</mosaic_0001>

<bundles_post_ra>
// kernel: tpu_custom_call.1
= control target key start
LH: loop header
LB: loop body
LE: loop exit
PB: predicated region body
PF: predicated region fallthrough
CT: control target
= control target key end

     0   :  { %v21_v0 = vlaneseq  ;;  %vm43_vm0 = vcmask 130048   ;;  %s767_s0 = inlined_call_operand.vmem [shape: s32[1,8], index: 0, kind: input, shape index: {}]   ;;  %s768_s1 = inlined_call_operand.vmem [shape: s32[1,8], index: 1, kind: input, shape index: {}]   ;;  %s769_s2 = inlined_call_operand.vmem [shape: f32[1,64], index: 2, kind: input, shape index: {}]   ;;  %s770_s3 = inlined_call_operand.vmem [shape: f32[1,64], index: 3, kind: input, shape index: {}]   ;;  %s771_s4 = inlined_call_operand.vmem [shape: f32[64,16], index: 4, kind: input, shape index: {}]   ;;  %s772_s5 = inlined_call_operand.hbm [shape: f32[1,8], index: 5, kind: output, shape index: {}]  }
   0x1   :  { %v470_v1 = vld [vmem:[%s767_s0] ss:$0 sm:$0xff] }
   0x2   :  { %v35_v2 = vld [vmem:[%s771_s4] sm:$0xff]  ;;  %v22_v3 = vshrl.u32 %v21_v0, 7 }
   0x3   :  { %v483_v4 = vld [vmem:[%s768_s1] ss:$0 sm:$0xff]  ;;  %540 = vmatprep.mubr.msk.f32.mxu0 %vm43_vm0, %v35_v2  ;;  %556 = vmatprep.mubr.msk.f32.mxu1 %vm43_vm0, %v35_v2 }
   0x4   :  { %10 = vsyncpa [#allocation3], 0  ;;  %v23_v5 = vadd.s32 8, %v22_v3  ;;  %vm29_vm1 = vcmp.eq.s32.totalorder %v22_v3, %v470_v1  ;;  %vm178_vm2 = vcmp.eq.s32.totalorder %v22_v3, %v483_v4  ;;  %v668_v6 = vmov 1.0|1.0   ;;  %v36_v7 = vld [vmem:[%s771_s4 + $0x8] sm:$0xff] }
   0x5   :  { %v37_v8 = vld [vmem:[%s771_s4 + $0x10] sm:$0xff]  ;;  %v38_v9 = vld [vmem:[%s771_s4 + $0x18] sm:$0xff]  ;;  %v39_v10 = vld [vmem:[%s771_s4 + $0x20] sm:$0xff]  ;;  %v669_v14 = vmov 0.0|0.0   ;;  %vm670_vm7 = vmmov 0   ;;  %v671_v15 = vmov 0.0  }
   0x6   :  { %vm30_vm3 = vcmp.eq.s32.totalorder %v23_v5, %v470_v1  ;;  %vm179_vm4 = vcmp.eq.s32.totalorder %v23_v5, %v483_v4  ;;  %v40_v11 = vld [vmem:[%s771_s4 + $0x28] sm:$0xff]  ;;  %v41_v12 = vld [vmem:[%s771_s4 + $0x30] sm:$0xff]  ;;  %v42_v13 = vld [vmem:[%s771_s4 + $0x38] sm:$0xff]  ;;  %vm307_vm8 = vcmask 523264   ;;  %s672_s14 = smov [#allocation2]   ;;  %vm454_vm9 = vcmask 57344  }
   0x7   :  { %vm606_vm5 = vmpackc.low %vm30_vm3, %vm29_vm1  ;;  %v289_v56 = vld [vmem:[%s769_s2] sm:$0x1]  ;;  %s462_s15 = sshll.u32 %s672_s14, 4  ;;  %s463_s15 = int_to_ptr.vmem [resolvable:$true] %s462_s15 }
   0x8   :  { %607 = vmatprep.subr.msk.bf16.mxu0 %vm606_vm5, %v668_v6  ;;  %vm610_vm6 = vmpackc.low %vm179_vm4, %vm178_vm2  ;;  %v298_v57 = vld [vmem:[%s770_s3] sm:$0x1]  ;;  %s644_s2 = scalar_lea.vmem %s463_s15, 16  ;;  %s648_s16 = scalar_lea.vmem %s463_s15, 32 }
   0x9   :  { %611 = vmatprep.subr.msk.bf16.mxu1 %vm610_vm6, %v668_v6  ;;  %609 = vmatpush3.bf16.msk.msra.mxu0 %vm606_vm5, %v668_v6  ;;  %p645_p0 = scmp.ne.s32.totalorder %s463_s15, %s644_s2  ;;  %p649_p1 = scmp.lt.s32.totalorder %s463_s15, %s463_s15 }
   0xa   :  { %613 = vmatpush3.bf16.msk.msra.mxu1 %vm610_vm6, %v668_v6  ;;  %626 = vmatprep.subr.bf16.mxu0 %v669_v14  ;;  %p650_p2 = scmp.lt.s32.totalorder %s648_s16, %s644_s2 }
   0xb   :  { %614 = vmatprep.subr.bf16.mxu1 %v669_v14 }
   0xc   :  { %541 = vmatmul.mubr.msk.f32.vlgmr.msra.gmra.mrb[0].mxu0 %vm43_vm0, %v36_v7  ;;  %p651_p3 = por %p650_p2, %p649_p1 }
   0xd   :  { %557 = vmatmul.mubr.msk.f32.vlgmr.msra.gmra.mrb[0].mxu1 %vm43_vm0, %v36_v7  ;;  %543 = vmatprep.mubr.msk.f32.mxu0 %vm43_vm0, %v37_v8 }
   0xe   :  { %559 = vmatprep.mubr.msk.f32.mxu1 %vm43_vm0, %v37_v8  ;;  %p652_p4 = pnand %p651_p3, %p645_p0 }
  0x10   :  { %544 = vmatmul.mubr.msk.f32.gmra.mrb[2].mxu0 %vm43_vm0, %v38_v9 }
  0x11   :  { %560 = vmatmul.mubr.msk.f32.gmra.mrb[2].mxu1 %vm43_vm0, %v38_v9  ;;  %546 = vmatprep.mubr.msk.f32.mxu0 %vm43_vm0, %v39_v10 }
  0x12   :  { %562 = vmatprep.mubr.msk.f32.mxu1 %vm43_vm0, %v39_v10 }
  0x14   :  { %547 = vmatmul.mubr.msk.f32.gmra.mrb[4].mxu0 %vm43_vm0, %v40_v11 }
  0x15   :  { %563 = vmatmul.mubr.msk.f32.gmra.mrb[4].mxu1 %vm43_vm0, %v40_v11  ;;  %549 = vmatprep.mubr.msk.f32.mxu0 %vm43_vm0, %v41_v12 }
  0x16   :  { %565 = vmatprep.mubr.msk.f32.mxu1 %vm43_vm0, %v41_v12 }
  0x18   :  { %550 = vmatmul.mubr.msk.f32.gmra.mrb[6].mxu0 %vm43_vm0, %v42_v13 }
  0x19   :  { %566 = vmatmul.mubr.msk.f32.gmra.mrb[6].mxu1 %vm43_vm0, %v42_v13  ;;  %603 = vmatprep.mubr.msk.f32.mxu0 %vm670_vm7, %v671_v15 }
  0x1a   :  { %584 = vmatprep.mubr.msk.f32.mxu1 %vm670_vm7, %v671_v15 }
  0xdf   :  { %v542_v16 = vpop.f32.mrb[0].mxu0 }
  0xe0   :  { %v558_v17 = vpop.f32.mrb[0].mxu1  ;;  %v134_v18 = vpop.f32.mrb[1].mxu0 }
  0xe1   :  { %v291_v19 = vmul.f32 %v558_v17, %v542_v16  ;;  %v250_v20 = vpop.f32.mrb[1].mxu1 }
  0xe2   :  { %v290_v21 = vmul.f32 %v250_v20, %v134_v18 }
  0xe3   :  { %v545_v22 = vpop.f32.mrb[2].mxu0 }
  0xe4   :  { %v627_v23 = vpack.c.bf16 %v291_v19, %v290_v21  ;;  %v561_v24 = vpop.f32.mrb[2].mxu1  ;;  %v144_v25 = vpop.f32.mrb[3].mxu0 }
  0xe5   :  { %v293_v26 = vmul.f32 %v561_v24, %v545_v22  ;;  %v260_v27 = vpop.f32.mrb[3].mxu1 }
  0xe6   :  { %v292_v28 = vmul.f32 %v260_v27, %v144_v25  ;;  %628 = vmatpush3.bf16.msra.mxu0 %v627_v23 }
  0xe7   :  { %v548_v29 = vpop.f32.mrb[4].mxu0  ;;  %629 = vmatprep.subr.bf16.mxu0 %v669_v14 }
  0xe8   :  { %v630_v30 = vpack.c.bf16 %v293_v26, %v292_v28  ;;  %v304_v31 = vmul.f32 %v558_v17, %v548_v29  ;;  %v564_v32 = vpop.f32.mrb[4].mxu1  ;;  %v154_v33 = vpop.f32.mrb[5].mxu0 }
  0xe9   :  { %v295_v34 = vmul.f32 %v564_v32, %v548_v29  ;;  %v300_v35 = vmul.f32 %v564_v32, %v542_v16  ;;  %v303_v36 = vmul.f32 %v250_v20, %v154_v33  ;;  %v270_v37 = vpop.f32.mrb[5].mxu1 }
  0xea   :  { %v294_v38 = vmul.f32 %v270_v37, %v154_v33  ;;  %v299_v39 = vmul.f32 %v270_v37, %v134_v18  ;;  %631 = vmatpush3.bf16.msra.mxu0 %v630_v30 }
  0xeb   :  { %v621_v40 = vpack.c.bf16 %v304_v31, %v303_v36  ;;  %v551_v41 = vpop.f32.mrb[6].mxu0  ;;  %632 = vmatprep.subr.bf16.mxu0 %v669_v14 }
  0xec   :  { %v615_v42 = vpack.c.bf16 %v300_v35, %v299_v39  ;;  %v633_v43 = vpack.c.bf16 %v295_v34, %v294_v38  ;;  %v306_v44 = vmul.f32 %v561_v24, %v551_v41  ;;  %v567_v45 = vpop.f32.mrb[6].mxu1  ;;  %v164_v46 = vpop.f32.mrb[7].mxu0 }
  0xed   :  { %v297_v47 = vmul.f32 %v567_v45, %v551_v41  ;;  %v302_v48 = vmul.f32 %v567_v45, %v545_v22  ;;  %v305_v49 = vmul.f32 %v260_v27, %v164_v46  ;;  %v280_v50 = vpop.f32.mrb[7].mxu1 }
  0xee   :  { %v296_v51 = vmul.f32 %v280_v50, %v164_v46  ;;  %v301_v52 = vmul.f32 %v280_v50, %v144_v25  ;;  %616 = vmatpush3.bf16.msra.mxu1 %v615_v42  ;;  %634 = vmatpush3.bf16.msra.mxu0 %v633_v43 }
  0xef   :  { %v624_v53 = vpack.c.bf16 %v306_v44, %v305_v49  ;;  %617 = vmatprep.subr.bf16.mxu1 %v669_v14  ;;  %635 = vmatprep.subr.bf16.mxu0 %v669_v14 }
  0xf0   :  { %v618_v54 = vpack.c.bf16 %v302_v48, %v301_v52  ;;  %v636_v55 = vpack.c.bf16 %v297_v47, %v296_v51 }
  0xf2   :  { %619 = vmatpush3.bf16.msra.mxu1 %v618_v54  ;;  %637 = vmatpush3.bf16.msra.mxu0 %v636_v55 }
  0xf3   :  { %620 = vmatprep.subr.bf16.mxu1 %v669_v14 }
  0xf5   :  { %604 = vmatmul.mubr.msk.f32.vlgmr.msra.gmra.mrb[8].mxu0 %vm307_vm8, %v289_v56 }
  0xf6   :  { %622 = vmatpush3.bf16.msra.mxu1 %v621_v40 }
  0xf7   :  { %623 = vmatprep.subr.bf16.mxu1 %v669_v14 }
  0xfa   :  { %625 = vmatpush3.bf16.msra.mxu1 %v624_v53 }
  0xfd   :  { %585 = vmatmul.mubr.msk.f32.vlgmr.msra.gmra.mrb[8].mxu1 %vm307_vm8, %v298_v57 }
 0x1c8   :  { %v450_v58 = vpop.f32.mrb[8].mxu0 }
 0x1c9   :  { %v605_v59 = vpop.f32.mrb[9].mxu0 }
 0x1d0   :  { %v377_v60 = vpop.f32.mrb[8].mxu1 }
 0x1d1   :  { %v451_v61 = vadd.f32 %v450_v58, %v377_v60  ;;  %v586_v62 = vpop.f32.mrb[9].mxu1 }
 0x1d3   :  { %455 = vst.msk [vmem:[#allocation2] sm:$0x1] %vm454_vm9, %v451_v61 }
 0x1d4   :  { %655 = shalt.err (!%p652_p4)
}
 0x1d5   :  { %s656_s18 = scalar_lea.hbm %s772_s5, 16 }
 0x1d6   :  { %p657_p5 = scmp.ne.s32.totalorder %s772_s5, %s656_s18  ;;  %p660_p6 = scmp.lt.u32.totalorder %s656_s18, %s772_s5 }
 0x1d8   :  { %p662_p7 = pnand %p660_p6, %p657_p5 }
 0x1da   :  { %665 = shalt.err (!%p662_p7)
}
 0x1db   :  { %465 = dma.vmem_to_hbm [thread:$0]  %s463_s15, 16, %s772_s5, [#allocation3]  }
 0x1dc   :  { %666 = dma.done.wait [#allocation3], 16  }
 0x1dd   :  { %667 = vsyncadd [#allocation3], 4294967280 }
 0x1de   :  { %469 = vsyncpa [#allocation3], 1 }

</bundles_post_ra>
